<compile_context>
chip_gen: v6e
topology: v6e:2x2x1
jax: 0.10.0
libtpu: 0.0.40
codegen_flags: <defaults>
</compile_context>

<pallas_src>
import jax
import jax.numpy as jnp
from jax.experimental import pallas as pl
from jax.experimental.pallas import tpu as pltpu


# ---------------------------------------------------------------------------
# Pallas kernel: fused block-structured shared-group MLP + pair-mean
# ---------------------------------------------------------------------------
def _fused_analogy_kernel(x_ref, w1_ref, b1_ref, w2_ref, b2_ref, pfold_ref,
                          rules_ref, mean_ref):
    """One row-tile of the fused forward.

    x:     (TB, 2*3*e)       flattened (pair, row, e) features per batch item
    w1:    (2*3*e, 2*G*H)    block-structured layer-1 weights
    b1:    (1, 2*G*H)        f32 bias (added to the f32 accumulator)
    w2:    (2*G*H, 2*G*O)    block-diagonal layer-2 weights
    b2:    (1, 2*G*O)        f32 bias
    pfold: (2*G*O, G*O)      0.5 * [I ; I] pair-mean fold matrix (MXU, not XLU)
    rules: (TB, 2*G*O)       [mlp(first triple) | mlp(second triple)]
    mean:  (TB, G*O)         0.5 * (rules[:, :GO] + rules[:, GO:])
    """
    h = jnp.dot(x_ref[...], w1_ref[...], preferred_element_type=jnp.float32)
    h = jnp.maximum(h + b1_ref[...], 0.0)
    y = jnp.dot(h.astype(w2_ref.dtype), w2_ref[...],
                preferred_element_type=jnp.float32) + b2_ref[...]

    rules_ref[...] = y.astype(rules_ref.dtype)
    # Pair-mean as a small MXU matmul (keeps the lane-split off the VPU/XLU path).
    mean_ref[...] = jnp.dot(y.astype(pfold_ref.dtype), pfold_ref[...],
                            preferred_element_type=jnp.float32
                            ).astype(mean_ref.dtype)


# ---------------------------------------------------------------------------
# Host-side (one-time) weight scatter into lane-dense block matrices
# ---------------------------------------------------------------------------
def _build_block_weights(params, groups, e, n_rows=3, pair=2):
    """Scatter the shared per-group MLP weights into dense block-structured matrices
    so the grouped MLP over both pair-rows becomes a single matmul chain.

    W1_full[p*3e + r*e + g*gs + j, p*G*H + g*H + h] = w1[r*gs + j, h]
    W2_full[p*G*H + g*H + h,       p*G*O + g*O + o] = w2[h, o]
    (zero elsewhere; biases are tiled to match the column layout)
    """
    w1, b1, w2, b2 = params
    gs = e // groups
    in_dim, hidden = w1.shape
    assert in_dim == n_rows * gs, "w1 rows must equal 3 * (e // groups)"
    out_dim = w2.shape[1]

    eye_g = jnp.eye(groups, dtype=w1.dtype)

    # group-level block structure
    w1_big = jnp.einsum("rjh,gk->rgjkh", w1.reshape(n_rows, gs, hidden), eye_g)
    w1_big = w1_big.reshape(n_rows * e, groups * hidden)            # (3e, G*H)
    w2_big = jnp.einsum("ho,gk->ghko", w2, eye_g)
    w2_big = w2_big.reshape(groups * hidden, groups * out_dim)      # (G*H, G*O)
    b1_big = jnp.tile(b1.reshape(1, hidden), (1, groups))           # (1, G*H)
    b2_big = jnp.tile(b2.reshape(1, out_dim), (1, groups))          # (1, G*O)

    # pair-level block-diagonal (both triples of each batch item in one matmul)
    eye_p = jnp.eye(pair, dtype=w1.dtype)
    w1_full = jnp.kron(eye_p, w1_big)                               # (2*3e, 2*G*H)
    w2_full = jnp.kron(eye_p, w2_big)                               # (2*G*H, 2*G*O)
    b1_full = jnp.tile(b1_big, (1, pair)).astype(jnp.float32)
    b2_full = jnp.tile(b2_big, (1, pair)).astype(jnp.float32)
    return w1_full, b1_full, w2_full, b2_full


def _round_up(x, m):
    return ((x + m - 1) // m) * m


# ---------------------------------------------------------------------------
# Forward wrapper (mirrors SpeakerAnalogyModel.forward -> (mean, rules))
# ---------------------------------------------------------------------------
def speaker_analogy_forward(x, params, groups, *, row_tile=None,
                            compute_dtype=jnp.bfloat16, out_dtype=None):
    b, n, e = x.shape
    assert n == 6, "forward expects n == 6 so that x.view(2*b, 3, e) is valid"

    out_dtype = x.dtype if out_dtype is None else out_dtype

    w1f, b1f, w2f, b2f = _build_block_weights(params, groups, e)
    f2 = w2f.shape[1]            # 2 * G * O  (rules width, lane-dense: 128 at demo sizes)
    f = f2 // 2                  # G * O      (mean width)

    # Pair-mean fold matrix: mean = y @ (0.5*[I;I]) — an MXU op instead of an XLU split.
    eye_f = jnp.eye(f, dtype=jnp.float32)
    pfold = (0.5 * jnp.concatenate([eye_f, eye_f], axis=0)).astype(compute_dtype)

    # Upstream should already hand x over in `compute_dtype` (bf16) so the HBM read
    # of x is actually halved; the astype is a no-op in that case.
    x_flat = x.reshape(b, n * e).astype(compute_dtype)   # (b, 6e) = (b, 192)
    w1f = w1f.astype(compute_dtype)
    w2f = w2f.astype(compute_dtype)

    # Row tile: large enough to amortize per-grid-step overhead, but capped so that
    # whenever b > 8 the grid has >= 2 steps (v7x dual-TC split via "parallel").
    if row_tile is None:
        row_tile = 4096 if jnp.dtype(compute_dtype).itemsize <= 2 else 2048
    if b <= 8:
        tb = b                               # full-array block (valid: equals array dim)
    else:
        tb = min(row_tile, _round_up(pl.cdiv(b, 2), 8))
    grid = (pl.cdiv(b, tb),)

    # VMEM budget from the chosen tile: pipelined activation buffers + resident weights.
    itemsize = jnp.dtype(compute_dtype).itemsize
    out_itemsize = jnp.dtype(out_dtype).itemsize
    act_bytes = tb * (n * e) * itemsize + tb * (f2 + f) * out_itemsize
    wgt_bytes = ((w1f.size + w2f.size + pfold.size) * itemsize
                 + (b1f.size + b2f.size) * 4)
    vmem_limit = int(min(32 * 1024 * 1024,
                         max(8 * 1024 * 1024, 8 * act_bytes + 3 * wgt_bytes)))

    def _build_call(single_buffer_weights):
        def const_spec(shape):
            # Constant index_map: stays VMEM-resident across grid steps.
            if single_buffer_weights:
                return pl.BlockSpec(shape, lambda i: (0, 0),
                                    pipeline_mode=pl.Buffered(1))
            return pl.BlockSpec(shape, lambda i: (0, 0))

        return pl.pallas_call(
            _fused_analogy_kernel,
            out_shape=(jax.ShapeDtypeStruct((b, f2), out_dtype),
                       jax.ShapeDtypeStruct((b, f), out_dtype)),
            grid_spec=pltpu.PrefetchScalarGridSpec(
                num_scalar_prefetch=0,
                grid=grid,
                in_specs=[
                    pl.BlockSpec((tb, n * e), lambda i: (i, 0)),   # x tile (pipelined)
                    const_spec(w1f.shape),
                    const_spec(b1f.shape),
                    const_spec(w2f.shape),
                    const_spec(b2f.shape),
                    const_spec(pfold.shape),
                ],
                out_specs=(
                    pl.BlockSpec((tb, f2), lambda i: (i, 0)),      # rules (lane-dense 128)
                    pl.BlockSpec((tb, f), lambda i: (i, 0)),       # fused pair-mean
                ),
            ),
            compiler_params=pltpu.CompilerParams(
                dimension_semantics=("parallel",),                 # megacore / v7x 2-TC split
                vmem_limit_bytes=vmem_limit,
            ),
        )

    args = (x_flat, w1f, b1f, w2f, b2f, pfold)
    try:
        rules_flat, mean = _build_call(True)(*args)
    except Exception:
        # TODO(synk): this jax version rejected pl.Buffered(1) single-buffering of the
        # resident weights; fall back to default (double-buffered) pipelining.
        rules_flat, mean = _build_call(False)(*args)

    rules = rules_flat.reshape(b, 2, f)    # free metadata reshape (same memory layout)
    return mean, rules


# ---------------------------------------------------------------------------
# Pure-JAX reference (faithful grouped-MLP formulation, for correctness check)
# ---------------------------------------------------------------------------
def _reference(x, params, groups):
    x = x.astype(jnp.float32)
    b, n, e = x.shape
    gs = e // groups
    w1, b1, w2, b2 = params
    x2 = x.reshape(2 * b, 3, e)
    xg = (x2.reshape(2 * b, 3, groups, gs)
            .transpose(0, 2, 1, 3)
            .reshape(2 * b * groups, 3 * gs))
    h = jnp.maximum(xg @ w1 + b1.reshape(1, -1), 0.0)
    y = h @ w2 + b2.reshape(1, -1)
    feat = y.reshape(2 * b, groups * w2.shape[1])
    rules = feat.reshape(b, 2, -1)
    return jnp.mean(rules, axis=1), rules


# ---------------------------------------------------------------------------
# Main
# ---------------------------------------------------------------------------
if __name__ == "__main__":
    # Small shapes consistent with the forward: b=2, n=6 (-> 2b rows of 3), e=32.
    b, n, e = 2, 6, 32
    groups = 4                       # discri_analogy_shared_mlp_configs
    group_size = e // groups         # 8
    in_dim = 3 * group_size          # 24  (flattened per-group input)
    hidden = 32
    out_dim = 16

    key = jax.random.PRNGKey(0)
    kx, k1, k2, k3, k4, kx2 = jax.random.split(key, 6)

    x_f32 = jax.random.normal(kx, (b, n, e), dtype=jnp.float32)

    # Deterministic parameter init (synthetic; not a checkpoint load).
    w1 = jax.random.normal(k1, (in_dim, hidden), dtype=jnp.float32) * 0.1
    b1 = jax.random.normal(k2, (hidden,), dtype=jnp.float32) * 0.01
    w2 = jax.random.normal(k3, (hidden, out_dim), dtype=jnp.float32) * 0.1
    b2 = jax.random.normal(k4, (out_dim,), dtype=jnp.float32) * 0.01
    params = (w1, b1, w2, b2)

    # --- f32 compute path: tight numerical check against the reference ---
    mean_f32, rules_f32 = speaker_analogy_forward(x_f32, params, groups,
                                                  compute_dtype=jnp.float32)
    mean_f32 = jax.block_until_ready(mean_f32)
    rules_f32 = jax.block_until_ready(rules_f32)
    ref_mean, ref_rules = _reference(x_f32, params, groups)
    assert mean_f32.shape == (b, groups * out_dim), mean_f32.shape
    assert rules_f32.shape == (b, 2, groups * out_dim), rules_f32.shape
    assert jnp.allclose(mean_f32, ref_mean, atol=1e-4, rtol=1e-4)
    assert jnp.allclose(rules_f32, ref_rules, atol=1e-4, rtol=1e-4)

    # --- default bf16 path (x supplied in bf16 upstream -> bf16 outputs) ---
    x_bf16 = x_f32.astype(jnp.bfloat16)
    mean_bf, rules_bf = speaker_analogy_forward(x_bf16, params, groups)
    mean_bf = jax.block_until_ready(mean_bf)
    rules_bf = jax.block_until_ready(rules_bf)
    ref_mean_b, ref_rules_b = _reference(x_bf16, params, groups)
    assert mean_bf.dtype == jnp.bfloat16 and rules_bf.dtype == jnp.bfloat16
    assert jnp.allclose(mean_bf.astype(jnp.float32), ref_mean_b,
                        atol=3e-2, rtol=3e-2)
    assert jnp.allclose(rules_bf.astype(jnp.float32), ref_rules_b,
                        atol=3e-2, rtol=3e-2)

    # --- larger batch: exercises a >= 2-step grid with a partial last tile ---
    bb = 20
    xb = jax.random.normal(kx2, (bb, n, e), dtype=jnp.float32).astype(jnp.bfloat16)
    mean_big, rules_big = speaker_analogy_forward(xb, params, groups)
    mean_big = jax.block_until_ready(mean_big)
    rules_big = jax.block_until_ready(rules_big)
    ref_mean2, ref_rules2 = _reference(xb, params, groups)
    assert mean_big.shape == (bb, groups * out_dim)
    assert rules_big.shape == (bb, 2, groups * out_dim)
    assert jnp.allclose(mean_big.astype(jnp.float32), ref_mean2,
                        atol=3e-2, rtol=3e-2)
    assert jnp.allclose(rules_big.astype(jnp.float32), ref_rules2,
                        atol=3e-2, rtol=3e-2)

    print("KERNEL_OK")
</pallas_src>

<mosaic_0001>
module attributes {stable_mosaic.version = 11 : i64} {
  func.func @_fused_analogy_kernel(%arg0: i32, %arg1: memref<2x192xf32, #tpu.memory_space<vmem>>, %arg2: memref<192x256xf32, #tpu.memory_space<vmem>>, %arg3: memref<1x256xf32, #tpu.memory_space<vmem>>, %arg4: memref<256x128xf32, #tpu.memory_space<vmem>>, %arg5: memref<1x128xf32, #tpu.memory_space<vmem>>, %arg6: memref<128x64xf32, #tpu.memory_space<vmem>>, %arg7: memref<2x128xf32, #tpu.memory_space<vmem>>, %arg8: memref<2x64xf32, #tpu.memory_space<vmem>>) attributes {dimension_semantics = [#tpu.dimension_semantics<parallel>], iteration_bounds = array<i64: 1>, scalar_prefetch = 0 : i64, scratch_operands = 0 : i64, tpu.core_type = #tpu.core_type<tc>, window_params = [{transform_indices = @transform_0, window_bounds = array<i64: 2, 192>}, {pipeline_mode = #tpu.pipeline_mode<synchronous>, transform_indices = @transform_1, window_bounds = array<i64: 192, 256>}, {pipeline_mode = #tpu.pipeline_mode<synchronous>, transform_indices = @transform_2, window_bounds = array<i64: 1, 256>}, {pipeline_mode = #tpu.pipeline_mode<synchronous>, transform_indices = @transform_3, window_bounds = array<i64: 256, 128>}, {pipeline_mode = #tpu.pipeline_mode<synchronous>, transform_indices = @transform_4, window_bounds = array<i64: 1, 128>}, {pipeline_mode = #tpu.pipeline_mode<synchronous>, transform_indices = @transform_5, window_bounds = array<i64: 128, 64>}, {transform_indices = @transform_6, window_bounds = array<i64: 2, 128>}, {transform_indices = @transform_7, window_bounds = array<i64: 2, 64>}]} {
    %c0 = arith.constant 0 : index
    %c0_0 = arith.constant 0 : index
    %0 = vector.load %arg1[%c0, %c0_0] : memref<2x192xf32, #tpu.memory_space<vmem>>, vector<2x192xf32>
    %c0_1 = arith.constant 0 : index
    %c0_2 = arith.constant 0 : index
    %1 = vector.load %arg2[%c0_1, %c0_2] : memref<192x256xf32, #tpu.memory_space<vmem>>, vector<192x256xf32>
    %cst = arith.constant dense<0.000000e+00> : vector<2x256xf32>
    %2 = tpu.matmul %0, %1, %cst {dimension_numbers = #tpu.dot_dimension_numbers<[1], [0], [0], [1], [0, 0, 1, 1], [], []>} : vector<2x192xf32>, vector<192x256xf32>, vector<2x256xf32> -> vector<2x256xf32>
    %c0_3 = arith.constant 0 : index
    %c0_4 = arith.constant 0 : index
    %3 = vector.load %arg3[%c0_3, %c0_4] : memref<1x256xf32, #tpu.memory_space<vmem>>, vector<1x256xf32>
    %4 = vector.broadcast %3 : vector<1x256xf32> to vector<2x256xf32>
    %5 = arith.addf %2, %4 : vector<2x256xf32>
    %cst_5 = arith.constant 0.000000e+00 : f32
    %6 = vector.broadcast %cst_5 : f32 to vector<2x256xf32>
    %7 = arith.maximumf %5, %6 : vector<2x256xf32>
    %c0_6 = arith.constant 0 : index
    %c0_7 = arith.constant 0 : index
    %8 = vector.load %arg4[%c0_6, %c0_7] : memref<256x128xf32, #tpu.memory_space<vmem>>, vector<256x128xf32>
    %cst_8 = arith.constant dense<0.000000e+00> : vector<2x128xf32>
    %9 = tpu.matmul %7, %8, %cst_8 {dimension_numbers = #tpu.dot_dimension_numbers<[1], [0], [0], [1], [0, 0, 1, 1], [], []>} : vector<2x256xf32>, vector<256x128xf32>, vector<2x128xf32> -> vector<2x128xf32>
    %c0_9 = arith.constant 0 : index
    %c0_10 = arith.constant 0 : index
    %10 = vector.load %arg5[%c0_9, %c0_10] : memref<1x128xf32, #tpu.memory_space<vmem>>, vector<1x128xf32>
    %11 = vector.broadcast %10 : vector<1x128xf32> to vector<2x128xf32>
    %12 = arith.addf %9, %11 : vector<2x128xf32>
    %c0_11 = arith.constant 0 : index
    %c0_12 = arith.constant 0 : index
    %13 = vector.load %arg7[%c0_11, %c0_12] : memref<2x128xf32, #tpu.memory_space<vmem>>, vector<2x128xf32>
    tpu.vector_store %arg7[%c0_11, %c0_12], %12 {strides = array<i32>} : memref<2x128xf32, #tpu.memory_space<vmem>>, vector<2x128xf32>,
    %c0_13 = arith.constant 0 : index
    %c0_14 = arith.constant 0 : index
    %14 = vector.load %arg6[%c0_13, %c0_14] : memref<128x64xf32, #tpu.memory_space<vmem>>, vector<128x64xf32>
    %cst_15 = arith.constant dense<0.000000e+00> : vector<2x64xf32>
    %15 = tpu.matmul %12, %14, %cst_15 {dimension_numbers = #tpu.dot_dimension_numbers<[1], [0], [0], [1], [0, 0, 1, 1], [], []>} : vector<2x128xf32>, vector<128x64xf32>, vector<2x64xf32> -> vector<2x64xf32>
    %c0_16 = arith.constant 0 : index
    %c0_17 = arith.constant 0 : index
    %16 = vector.load %arg8[%c0_16, %c0_17] : memref<2x64xf32, #tpu.memory_space<vmem>>, vector<2x64xf32>
    tpu.vector_store %arg8[%c0_16, %c0_17], %15 {strides = array<i32>} : memref<2x64xf32, #tpu.memory_space<vmem>>, vector<2x64xf32>,
    return
  }
  func.func @transform_0(%arg0: i32) -> (i32, i32) {
    %c0_i32 = arith.constant 0 : i32
    %c0_i32_0 = arith.constant 0 : i32
    return %arg0, %c0_i32 : i32, i32
  }
  func.func @transform_1(%arg0: i32) -> (i32, i32) {
    %c0_i32 = arith.constant 0 : i32
    %c0_i32_0 = arith.constant 0 : i32
    %c0_i32_1 = arith.constant 0 : i32
    return %c0_i32, %c0_i32_0 : i32, i32
  }
  func.func @transform_2(%arg0: i32) -> (i32, i32) {
    %c0_i32 = arith.constant 0 : i32
    %c0_i32_0 = arith.constant 0 : i32
    %c0_i32_1 = arith.constant 0 : i32
    return %c0_i32, %c0_i32_0 : i32, i32
  }
  func.func @transform_3(%arg0: i32) -> (i32, i32) {
    %c0_i32 = arith.constant 0 : i32
    %c0_i32_0 = arith.constant 0 : i32
    %c0_i32_1 = arith.constant 0 : i32
    return %c0_i32, %c0_i32_0 : i32, i32
  }
  func.func @transform_4(%arg0: i32) -> (i32, i32) {
    %c0_i32 = arith.constant 0 : i32
    %c0_i32_0 = arith.constant 0 : i32
    %c0_i32_1 = arith.constant 0 : i32
    return %c0_i32, %c0_i32_0 : i32, i32
  }
  func.func @transform_5(%arg0: i32) -> (i32, i32) {
    %c0_i32 = arith.constant 0 : i32
    %c0_i32_0 = arith.constant 0 : i32
    %c0_i32_1 = arith.constant 0 : i32
    return %c0_i32, %c0_i32_0 : i32, i32
  }
  func.func @transform_6(%arg0: i32) -> (i32, i32) {
    %c0_i32 = arith.constant 0 : i32
    %c0_i32_0 = arith.constant 0 : i32
    return %arg0, %c0_i32 : i32, i32
  }
  func.func @transform_7(%arg0: i32) -> (i32, i32) {
    %c0_i32 = arith.constant 0 : i32
    %c0_i32_0 = arith.constant 0 : i32
    return %arg0, %c0_i32 : i32, i32
  }
}

module attributes {stable_mosaic.version = 11 : i64} {
  func.func @_fused_analogy_kernel(%arg0: i32, %arg1: memref<2x192xf32, #tpu.memory_space<vmem>>, %arg2: memref<192x256xf32, #tpu.memory_space<vmem>>, %arg3: memref<1x256xf32, #tpu.memory_space<vmem>>, %arg4: memref<256x128xf32, #tpu.memory_space<vmem>>, %arg5: memref<1x128xf32, #tpu.memory_space<vmem>>, %arg6: memref<128x64xf32, #tpu.memory_space<vmem>>, %arg7: memref<2x128xf32, #tpu.memory_space<vmem>>, %arg8: memref<2x64xf32, #tpu.memory_space<vmem>>) attributes {dimension_semantics = [#tpu.dimension_semantics<parallel>], iteration_bounds = array<i64: 1>, scalar_prefetch = 0 : i64, scratch_operands = 0 : i64, tpu.core_type = #tpu.core_type<tc>, window_params = [{transform_indices = @transform_0, window_bounds = array<i64: 2, 192>}, {pipeline_mode = #tpu.pipeline_mode<synchronous>, transform_indices = @transform_1, window_bounds = array<i64: 192, 256>}, {pipeline_mode = #tpu.pipeline_mode<synchronous>, transform_indices = @transform_2, window_bounds = array<i64: 1, 256>}, {pipeline_mode = #tpu.pipeline_mode<synchronous>, transform_indices = @transform_3, window_bounds = array<i64: 256, 128>}, {pipeline_mode = #tpu.pipeline_mode<synchronous>, transform_indices = @transform_4, window_bounds = array<i64: 1, 128>}, {pipeline_mode = #tpu.pipeline_mode<synchronous>, transform_indices = @transform_5, window_bounds = array<i64: 128, 64>}, {transform_indices = @transform_6, window_bounds = array<i64: 2, 128>}, {transform_indices = @transform_7, window_bounds = array<i64: 2, 64>}]} {
    %c0 = arith.constant 0 : index
    %c0_0 = arith.constant 0 : index
    %0 = vector.load %arg1[%c0, %c0_0] : memref<2x192xf32, #tpu.memory_space<vmem>>, vector<2x192xf32>
    %c0_1 = arith.constant 0 : index
    %c0_2 = arith.constant 0 : index
    %1 = vector.load %arg2[%c0_1, %c0_2] : memref<192x256xf32, #tpu.memory_space<vmem>>, vector<192x256xf32>
    %cst = arith.constant dense<0.000000e+00> : vector<2x256xf32>
    %2 = tpu.matmul %0, %1, %cst {dimension_numbers = #tpu.dot_dimension_numbers<[1], [0], [0], [1], [0, 0, 1, 1], [], []>} : vector<2x192xf32>, vector<192x256xf32>, vector<2x256xf32> -> vector<2x256xf32>
    %c0_3 = arith.constant 0 : index
    %c0_4 = arith.constant 0 : index
    %3 = vector.load %arg3[%c0_3, %c0_4] : memref<1x256xf32, #tpu.memory_space<vmem>>, vector<1x256xf32>
    %4 = vector.broadcast %3 : vector<1x256xf32> to vector<2x256xf32>
    %5 = arith.addf %2, %4 : vector<2x256xf32>
    %cst_5 = arith.constant 0.000000e+00 : f32
    %6 = vector.broadcast %cst_5 : f32 to vector<2x256xf32>
    %7 = arith.maximumf %5, %6 : vector<2x256xf32>
    %c0_6 = arith.constant 0 : index
    %c0_7 = arith.constant 0 : index
    %8 = vector.load %arg4[%c0_6, %c0_7] : memref<256x128xf32, #tpu.memory_space<vmem>>, vector<256x128xf32>
    %cst_8 = arith.constant dense<0.000000e+00> : vector<2x128xf32>
    %9 = tpu.matmul %7, %8, %cst_8 {dimension_numbers = #tpu.dot_dimension_numbers<[1], [0], [0], [1], [0, 0, 1, 1], [], []>} : vector<2x256xf32>, vector<256x128xf32>, vector<2x128xf32> -> vector<2x128xf32>
    %c0_9 = arith.constant 0 : index
    %c0_10 = arith.constant 0 : index
    %10 = vector.load %arg5[%c0_9, %c0_10] : memref<1x128xf32, #tpu.memory_space<vmem>>, vector<1x128xf32>
    %11 = vector.broadcast %10 : vector<1x128xf32> to vector<2x128xf32>
    %12 = arith.addf %9, %11 : vector<2x128xf32>
    %c0_11 = arith.constant 0 : index
    %c0_12 = arith.constant 0 : index
    %13 = vector.load %arg7[%c0_11, %c0_12] : memref<2x128xf32, #tpu.memory_space<vmem>>, vector<2x128xf32>
    tpu.vector_store %arg7[%c0_11, %c0_12], %12 {strides = array<i32>} : memref<2x128xf32, #tpu.memory_space<vmem>>, vector<2x128xf32>,
    %c0_13 = arith.constant 0 : index
    %c0_14 = arith.constant 0 : index
    %14 = vector.load %arg6[%c0_13, %c0_14] : memref<128x64xf32, #tpu.memory_space<vmem>>, vector<128x64xf32>
    %cst_15 = arith.constant dense<0.000000e+00> : vector<2x64xf32>
    %15 = tpu.matmul %12, %14, %cst_15 {dimension_numbers = #tpu.dot_dimension_numbers<[1], [0], [0], [1], [0, 0, 1, 1], [], []>} : vector<2x128xf32>, vector<128x64xf32>, vector<2x64xf32> -> vector<2x64xf32>
    %c0_16 = arith.constant 0 : index
    %c0_17 = arith.constant 0 : index
    %16 = vector.load %arg8[%c0_16, %c0_17] : memref<2x64xf32, #tpu.memory_space<vmem>>, vector<2x64xf32>
    tpu.vector_store %arg8[%c0_16, %c0_17], %15 {strides = array<i32>} : memref<2x64xf32, #tpu.memory_space<vmem>>, vector<2x64xf32>,
    return
  }
  func.func @transform_0(%arg0: i32) -> (i32, i32) {
    %c0_i32 = arith.constant 0 : i32
    %c0_i32_0 = arith.constant 0 : i32
    return %arg0, %c0_i32 : i32, i32
  }
  func.func @transform_1(%arg0: i32) -> (i32, i32) {
    %c0_i32 = arith.constant 0 : i32
    %c0_i32_0 = arith.constant 0 : i32
    %c0_i32_1 = arith.constant 0 : i32
    return %c0_i32, %c0_i32_0 : i32, i32
  }
  func.func @transform_2(%arg0: i32) -> (i32, i32) {
    %c0_i32 = arith.constant 0 : i32
    %c0_i32_0 = arith.constant 0 : i32
    %c0_i32_1 = arith.constant 0 : i32
    return %c0_i32, %c0_i32_0 : i32, i32
  }
  func.func @transform_3(%arg0: i32) -> (i32, i32) {
    %c0_i32 = arith.constant 0 : i32
    %c0_i32_0 = arith.constant 0 : i32
    %c0_i32_1 = arith.constant 0 : i32
    return %c0_i32, %c0_i32_0 : i32, i32
  }
  func.func @transform_4(%arg0: i32) -> (i32, i32) {
    %c0_i32 = arith.constant 0 : i32
    %c0_i32_0 = arith.constant 0 : i32
    %c0_i32_1 = arith.constant 0 : i32
    return %c0_i32, %c0_i32_0 : i32, i32
  }
  func.func @transform_5(%arg0: i32) -> (i32, i32) {
    %c0_i32 = arith.constant 0 : i32
    %c0_i32_0 = arith.constant 0 : i32
    %c0_i32_1 = arith.constant 0 : i32
    return %c0_i32, %c0_i32_0 : i32, i32
  }
  func.func @transform_6(%arg0: i32) -> (i32, i32) {
    %c0_i32 = arith.constant 0 : i32
    %c0_i32_0 = arith.constant 0 : i32
    return %arg0, %c0_i32 : i32, i32
  }
  func.func @transform_7(%arg0: i32) -> (i32, i32) {
    %c0_i32 = arith.constant 0 : i32
    %c0_i32_0 = arith.constant 0 : i32
    return %arg0, %c0_i32 : i32, i32
  }
}

</mosaic_0001>

<bundles_post_ra>
// kernel: tpu_custom_call.1
= control target key start
LH: loop header
LB: loop body
LE: loop exit
PB: predicated region body
PF: predicated region fallthrough
CT: control target
= control target key end

     0   :  { %13 = vsyncpa [#allocation3], 0  ;;  %s760_s0 = inlined_call_operand.vmem [shape: f32[2,192], index: 0, kind: input, shape index: {}]   ;;  %s761_s1 = inlined_call_operand.hbm [shape: f32[192,256], index: 1, kind: input, shape index: {}]   ;;  %s762_s2 = inlined_call_operand.vmem [shape: f32[1,256], index: 2, kind: input, shape index: {}]   ;;  %s763_s3 = inlined_call_operand.hbm [shape: f32[256,128], index: 3, kind: input, shape index: {}]   ;;  %s764_s4 = inlined_call_operand.vmem [shape: f32[1,128], index: 4, kind: input, shape index: {}]   ;;  %s765_s5 = inlined_call_operand.vmem [shape: f32[128,64], index: 5, kind: input, shape index: {}]   ;;  %s766_s6 = inlined_call_operand.hbm [shape: f32[2,128], index: 6, kind: output, shape index: {0}]   ;;  %s767_s7 = inlined_call_operand.hbm [shape: f32[2,64], index: 7, kind: output, shape index: {1}]  }
   0x1   :  { %14 = vsyncpa [#allocation6], 0 }
   0x2   :  { %15 = vsyncpa [#allocation4], 0 }
   0x3   :  { %16 = vsyncpa [#allocation9], 0  ;;  %s618_s24 = smov [#allocation2]  }
   0x4   :  { %s24_s25 = sshll.u32 %s618_s24, 4  ;;  %s25_s25 = int_to_ptr.vmem [resolvable:$true] %s24_s25 }
   0x5   :  { %s538_s26 = scalar_lea.vmem %s25_s25, 6144  ;;  %p543_p1 = scmp.lt.s32.totalorder %s25_s25, %s25_s25 }
   0x6   :  { %p539_p0 = scmp.ne.s32.totalorder %s25_s25, %s538_s26  ;;  %p544_p2 = scmp.lt.s32.totalorder %s538_s26, %s538_s26 }
   0x8   :  { %p545_p3 = por %p544_p2, %p543_p1 }
   0xa   :  { %p546_p4 = pnand %p545_p3, %p539_p0 }
   0xc   :  { %549 = shalt.err (!%p546_p4)
}
   0xd   :  { %s619_s27 = smov 256   ;;  %s620_s28 = smov 16  }
   0xe   :  { %30 = dma.hbm_to_vmem [thread:$0]  %s761_s1, 6144, %s25_s25, [#allocation3], %s619_s27, %s619_s27, %s620_s28  }
   0xf   :  { %s621_s8 = smov [#allocation5]  }
  0x10   :  { %s38_s9 = sshll.u32 %s621_s8, 4  ;;  %s39_s9 = int_to_ptr.vmem [resolvable:$true] %s38_s9 }
  0x11   :  { %s558_s10 = scalar_lea.vmem %s39_s9, 4096  ;;  %p563_p6 = scmp.lt.s32.totalorder %s39_s9, %s39_s9 }
  0x12   :  { %p559_p5 = scmp.ne.s32.totalorder %s39_s9, %s558_s10  ;;  %p564_p7 = scmp.lt.s32.totalorder %s558_s10, %s558_s10 }
  0x14   :  { %p565_p8 = por %p564_p7, %p563_p6 }
  0x16   :  { %p566_p9 = pnand %p565_p8, %p559_p5 }
  0x18   :  { %569 = shalt.err (!%p566_p9)
}
  0x19   :  { %s622_s11 = smov 128   ;;  %s623_s12 = smov 8  }
  0x1a   :  { %44 = dma.hbm_to_vmem [thread:$0]  %s763_s3, 4096, %s39_s9, [#allocation6], %s622_s11, %s622_s11, %s623_s12  }
  0x1b   :  { %610 = dma.done.wait [#allocation3], 6144  }
  0x1c   :  { %611 = vsyncadd [#allocation3], 4294961152 }
  0x1d   :  { %612 = dma.done.wait [#allocation6], 4096  }
  0x1e   :  { %613 = vsyncadd [#allocation6], 4294963200  ;;  %v87_v0 = vld [vmem:[#allocation2 + $0xf8] sm:$0xff]  ;;  %v86_v1 = vld [vmem:[#allocation2 + $0xf0] sm:$0xff]  ;;  %vm126_vm0 = vcmask 523264   ;;  %vm625_vm1 = vmmov 0  }
  0x1f   :  { %v85_v2 = vld [vmem:[#allocation2 + $0xe8] sm:$0xff]  ;;  %129 = vmatprep.subr.mxu0 %v87_v0  ;;  %v84_v3 = vld [vmem:[#allocation2 + $0xe0] sm:$0xff]  ;;  %v83_v4 = vld [vmem:[#allocation2 + $0xd8] sm:$0xff]  ;;  %s626_s22 = smov [#allocation7]  }
  0x20   :  { %130 = vmatpush1.msra.mxu0 %v86_v1  ;;  %v82_v5 = vld [vmem:[#allocation2 + $0xd0] sm:$0xff]  ;;  %v81_v6 = vld [vmem:[#allocation2 + $0xc8] sm:$0xff]  ;;  %v80_v7 = vld [vmem:[#allocation2 + $0xc0] sm:$0xff]  ;;  %s406_s23 = sshll.u32 %s626_s22, 4  ;;  %s407_s23 = int_to_ptr.vmem [resolvable:$true] %s406_s23 }
  0x21   :  { %131 = vmatprep.subr.mxu0 %v85_v2  ;;  %v79_v8 = vld [vmem:[#allocation2 + $0xb8] sm:$0xff]  ;;  %v78_v9 = vld [vmem:[#allocation2 + $0xb0] sm:$0xff]  ;;  %v77_v10 = vld [vmem:[#allocation2 + $0xa8] sm:$0xff]  ;;  %s570_s24 = scalar_lea.vmem %s407_s23, 32  ;;  %p575_p11 = scmp.lt.s32.totalorder %s407_s23, %s407_s23 }
  0x22   :  { %132 = vmatpush1.msra.mxu0 %v84_v3  ;;  %v76_v11 = vld [vmem:[#allocation2 + $0xa0] sm:$0xff]  ;;  %v75_v12 = vld [vmem:[#allocation2 + $0x98] sm:$0xff]  ;;  %v74_v13 = vld [vmem:[#allocation2 + $0x90] sm:$0xff]  ;;  %p571_p10 = scmp.ne.s32.totalorder %s407_s23, %s570_s24  ;;  %p576_p12 = scmp.lt.s32.totalorder %s570_s24, %s570_s24 }
  0x23   :  { %133 = vmatprep.subr.mxu0 %v83_v4  ;;  %v73_v14 = vld [vmem:[#allocation2 + $0x88] sm:$0xff]  ;;  %v72_v15 = vld [vmem:[#allocation2 + $0x80] sm:$0xff]  ;;  %v71_v16 = vld [vmem:[#allocation2 + $0x78] sm:$0xff] }
  0x24   :  { %134 = vmatpush1.msra.mxu0 %v82_v5  ;;  %v70_v17 = vld [vmem:[#allocation2 + $0x70] sm:$0xff]  ;;  %v69_v18 = vld [vmem:[#allocation2 + $0x68] sm:$0xff]  ;;  %v677_v19 = vld.sshfl [vmem:[%s760_s0] sm:$0x33 pattern:$0x76325410]  ;;  %p577_p13 = por %p576_p12, %p575_p11 }
  0x25   :  { %135 = vmatprep.subr.mxu0 %v81_v6  ;;  %v233_v20 = vld [vmem:[#allocation5 + $0xf8] sm:$0xff]  ;;  %v68_v22 = vld [vmem:[#allocation2 + $0x60] sm:$0xff]  ;;  %v124_v23 = vcombine.high %v677_v19, %v677_v19  ;;  %v232_v24 = vld [vmem:[#allocation5 + $0xf0] sm:$0xff] }
  0x26   :  { %136 = vmatpush1.msra.mxu0 %v80_v7  ;;  %v217_v21 = vld [vmem:[#allocation5 + $0x78] sm:$0xff]  ;;  %433 = vmatprep.subr.mxu1 %v233_v20  ;;  %v216_v26 = vld [vmem:[#allocation5 + $0x70] sm:$0xff]  ;;  %v231_v28 = vld [vmem:[#allocation5 + $0xe8] sm:$0xff]  ;;  %p578_p0 = pnand %p577_p13, %p571_p10 }
  0x27   :  { %137 = vmatprep.subr.mxu0 %v79_v8  ;;  %v67_v25 = vld [vmem:[#allocation2 + $0x58] sm:$0xff]  ;;  %434 = vmatpush3.msra.mxu1 %v217_v21  ;;  %v66_v27 = vld [vmem:[#allocation2 + $0x50] sm:$0xff]  ;;  %v65_v29 = vld [vmem:[#allocation2 + $0x48] sm:$0xff] }
  0x28   :  { %138 = vmatpush1.msra.mxu0 %v78_v9  ;;  %431 = vmatprep.mubr.msk.f32.mxu0 %vm126_vm0, %v124_v23  ;;  %v215_v30 = vld [vmem:[#allocation5 + $0x68] sm:$0xff]  ;;  %v64_v31 = vld [vmem:[#allocation2 + $0x40] sm:$0xff]  ;;  %v63_v33 = vld [vmem:[#allocation2 + $0x38] sm:$0xff] }
  0x29   :  { %139 = vmatprep.subr.mxu0 %v77_v10  ;;  %435 = vmatprep.subr.mxu1 %v232_v24  ;;  %v230_v32 = vld [vmem:[#allocation5 + $0xe0] sm:$0xff]  ;;  %v62_v35 = vld [vmem:[#allocation2 + $0x30] sm:$0xff]  ;;  %v229_v36 = vld [vmem:[#allocation5 + $0xd8] sm:$0xff] }
  0x2a   :  { %140 = vmatpush1.msra.mxu0 %v76_v11  ;;  %436 = vmatpush3.msra.mxu1 %v216_v26  ;;  %v214_v34 = vld [vmem:[#allocation5 + $0x60] sm:$0xff]  ;;  %v61_v37 = vld [vmem:[#allocation2 + $0x28] sm:$0xff]  ;;  %v213_v38 = vld [vmem:[#allocation5 + $0x58] sm:$0xff] }
  0x2b   :  { %141 = vmatprep.subr.mxu0 %v75_v12  ;;  %437 = vmatprep.subr.mxu1 %v231_v28  ;;  %v60_v39 = vld [vmem:[#allocation2 + $0x20] sm:$0xff]  ;;  %v228_v40 = vld [vmem:[#allocation5 + $0xd0] sm:$0xff]  ;;  %v59_v41 = vld [vmem:[#allocation2 + $0x18] sm:$0xff] }
  0x2c   :  { %142 = vmatpush1.msra.mxu0 %v74_v13  ;;  %438 = vmatpush3.msra.mxu1 %v215_v30  ;;  %v212_v42 = vld [vmem:[#allocation5 + $0x50] sm:$0xff]  ;;  %v227_v44 = vld [vmem:[#allocation5 + $0xc8] sm:$0xff]  ;;  %v56_v47 = vld [vmem:[#allocation2] sm:$0xff] }
  0x2d   :  { %143 = vmatprep.subr.mxu0 %v73_v14  ;;  %439 = vmatprep.subr.mxu1 %v230_v32  ;;  %v58_v43 = vld [vmem:[#allocation2 + $0x10] sm:$0xff]  ;;  %v57_v45 = vld [vmem:[#allocation2 + $0x8] sm:$0xff]  ;;  %v226_v48 = vld [vmem:[#allocation5 + $0xc0] sm:$0xff] }
  0x2e   :  { %144 = vmatpush1.msra.mxu0 %v72_v15  ;;  %440 = vmatpush3.msra.mxu1 %v214_v34  ;;  %v211_v46 = vld [vmem:[#allocation5 + $0x48] sm:$0xff]  ;;  %v103_v49 = vld [vmem:[#allocation2 + $0x178] sm:$0xff]  ;;  %v210_v50 = vld [vmem:[#allocation5 + $0x40] sm:$0xff] }
  0x2f   :  { %145 = vmatprep.subr.mxu0 %v71_v16  ;;  %441 = vmatprep.subr.mxu1 %v229_v36  ;;  %v102_v51 = vld [vmem:[#allocation2 + $0x170] sm:$0xff]  ;;  %v225_v52 = vld [vmem:[#allocation5 + $0xb8] sm:$0xff]  ;;  %v101_v53 = vld [vmem:[#allocation2 + $0x168] sm:$0xff] }
  0x30   :  { %146 = vmatpush1.msra.mxu0 %v70_v17  ;;  %442 = vmatpush3.msra.mxu1 %v213_v38  ;;  %v209_v54 = vld [vmem:[#allocation5 + $0x38] sm:$0xff]  ;;  %v100_v55 = vld [vmem:[#allocation2 + $0x160] sm:$0xff]  ;;  %v224_v56 = vld [vmem:[#allocation5 + $0xb0] sm:$0xff] }
  0x31   :  { %147 = vmatprep.subr.mxu0 %v69_v18  ;;  %443 = vmatprep.subr.mxu1 %v228_v40  ;;  %v99_v57 = vld [vmem:[#allocation2 + $0x158] sm:$0xff]  ;;  %v208_v58 = vld [vmem:[#allocation5 + $0x30] sm:$0xff]  ;;  %v223_v60 = vld [vmem:[#allocation5 + $0xa8] sm:$0xff]  ;;  %v624_v18 = vmov 0.0  }
  0x32   :  { %148 = vmatpush1.msra.mxu0 %v68_v22  ;;  %444 = vmatpush3.msra.mxu1 %v212_v42  ;;  %v98_v59 = vld [vmem:[#allocation2 + $0x150] sm:$0xff]  ;;  %v97_v61 = vld [vmem:[#allocation2 + $0x148] sm:$0xff]  ;;  %v96_v63 = vld [vmem:[#allocation2 + $0x140] sm:$0xff] }
  0x33   :  { %149 = vmatprep.subr.mxu0 %v67_v25  ;;  %445 = vmatprep.subr.mxu1 %v227_v44  ;;  %v207_v62 = vld [vmem:[#allocation5 + $0x28] sm:$0xff]  ;;  %v222_v0 = vld [vmem:[#allocation5 + $0xa0] sm:$0xff]  ;;  %v95_v1 = vld [vmem:[#allocation2 + $0x138] sm:$0xff] }
  0x34   :  { %150 = vmatpush1.msra.mxu0 %v66_v27  ;;  %446 = vmatpush3.msra.mxu1 %v211_v46  ;;  %v206_v2 = vld [vmem:[#allocation5 + $0x20] sm:$0xff]  ;;  %v94_v3 = vld [vmem:[#allocation2 + $0x130] sm:$0xff]  ;;  %v93_v4 = vld [vmem:[#allocation2 + $0x128] sm:$0xff] }
  0x35   :  { %151 = vmatprep.subr.mxu0 %v65_v29  ;;  %447 = vmatprep.subr.mxu1 %v226_v48  ;;  %v92_v5 = vld [vmem:[#allocation2 + $0x120] sm:$0xff]  ;;  %v91_v6 = vld [vmem:[#allocation2 + $0x118] sm:$0xff]  ;;  %v90_v7 = vld [vmem:[#allocation2 + $0x110] sm:$0xff] }
  0x36   :  { %152 = vmatpush1.msra.mxu0 %v64_v31  ;;  %448 = vmatpush3.msra.mxu1 %v210_v50  ;;  %v89_v8 = vld [vmem:[#allocation2 + $0x108] sm:$0xff]  ;;  %v88_v9 = vld [vmem:[#allocation2 + $0x100] sm:$0xff]  ;;  %v221_v10 = vld [vmem:[#allocation5 + $0x98] sm:$0xff] }
  0x37   :  { %153 = vmatprep.subr.mxu0 %v63_v33  ;;  %449 = vmatprep.subr.mxu1 %v225_v52  ;;  %v205_v11 = vld [vmem:[#allocation5 + $0x18] sm:$0xff]  ;;  %v220_v12 = vld [vmem:[#allocation5 + $0x90] sm:$0xff]  ;;  %v219_v14 = vld [vmem:[#allocation5 + $0x88] sm:$0xff] }
  0x38   :  { %154 = vmatpush1.msra.mxu0 %v62_v35  ;;  %450 = vmatpush3.msra.mxu1 %v209_v54  ;;  %v204_v13 = vld [vmem:[#allocation5 + $0x10] sm:$0xff]  ;;  %v203_v15 = vld [vmem:[#allocation5 + $0x8] sm:$0xff]  ;;  %v218_v16 = vld [vmem:[#allocation5 + $0x80] sm:$0xff] }
  0x39   :  { %155 = vmatprep.subr.mxu0 %v61_v37  ;;  %451 = vmatprep.subr.mxu1 %v224_v56  ;;  %v202_v17 = vld [vmem:[#allocation5] sm:$0xff]  ;;  %v327_v32 = vld [vmem:[%s765_s5 + $0x78] sm:$0xff]  ;;  %v326_v33 = vld [vmem:[%s765_s5 + $0x70] sm:$0xff] }
  0x3a   :  { %156 = vmatpush1.msra.mxu0 %v60_v39  ;;  %452 = vmatpush3.msra.mxu1 %v208_v58  ;;  %v104_v22 = vld [vmem:[%s762_s2] sm:$0x3]  ;;  %v325_v34 = vld [vmem:[%s765_s5 + $0x68] sm:$0xff]  ;;  %v323_v36 = vld [vmem:[%s765_s5 + $0x58] sm:$0xff] }
  0x3b   :  { %157 = vmatprep.subr.mxu0 %v59_v41  ;;  %453 = vmatprep.subr.mxu1 %v223_v60  ;;  %v324_v35 = vld [vmem:[%s765_s5 + $0x60] sm:$0xff]  ;;  %v322_v37 = vld [vmem:[%s765_s5 + $0x50] sm:$0xff]  ;;  %v321_v38 = vld [vmem:[%s765_s5 + $0x48] sm:$0xff] }
  0x3c   :  { %158 = vmatpush1.msra.mxu0 %v58_v43  ;;  %454 = vmatpush3.msra.mxu1 %v207_v62  ;;  %v320_v39 = vld [vmem:[%s765_s5 + $0x40] sm:$0xff]  ;;  %v319_v40 = vld [vmem:[%s765_s5 + $0x38] sm:$0xff]  ;;  %v318_v41 = vld [vmem:[%s765_s5 + $0x30] sm:$0xff] }
  0x3d   :  { %159 = vmatprep.subr.mxu0 %v57_v45  ;;  %455 = vmatprep.subr.mxu1 %v222_v0  ;;  %v317_v42 = vld [vmem:[%s765_s5 + $0x28] sm:$0xff]  ;;  %v316_v43 = vld [vmem:[%s765_s5 + $0x20] sm:$0xff]  ;;  %v315_v44 = vld [vmem:[%s765_s5 + $0x18] sm:$0xff] }
  0x3e   :  { %160 = vmatpush1.msra.mxu0 %v56_v47  ;;  %456 = vmatpush3.msra.mxu1 %v206_v2  ;;  %v314_v45 = vld [vmem:[%s765_s5 + $0x10] sm:$0xff]  ;;  %v313_v46 = vld [vmem:[%s765_s5 + $0x8] sm:$0xff]  ;;  %v312_v47 = vld [vmem:[%s765_s5] sm:$0xff] }
  0x3f   :  { %177 = vmatprep.subr.mxu0 %v103_v49  ;;  %457 = vmatprep.subr.mxu1 %v221_v10  ;;  %v432_v49 = vld [vmem:[%s764_s4] ss:$0 sm:$0xff] }
  0x40   :  { %178 = vmatpush2.msra.mxu0 %v102_v51  ;;  %458 = vmatpush3.msra.mxu1 %v205_v11 }
  0x41   :  { %179 = vmatprep.subr.mxu0 %v101_v53  ;;  %459 = vmatprep.subr.mxu1 %v220_v12 }
  0x42   :  { %180 = vmatpush2.msra.mxu0 %v100_v55  ;;  %460 = vmatpush3.msra.mxu1 %v204_v13 }
  0x43   :  { %181 = vmatprep.subr.mxu0 %v99_v57  ;;  %461 = vmatprep.subr.mxu1 %v219_v14 }
  0x44   :  { %182 = vmatpush2.msra.mxu0 %v98_v59  ;;  %462 = vmatpush3.msra.mxu1 %v203_v15 }
  0x45   :  { %183 = vmatprep.subr.mxu0 %v97_v61  ;;  %463 = vmatprep.subr.mxu1 %v218_v16 }
  0x46   :  { %184 = vmatpush2.msra.mxu0 %v96_v63  ;;  %464 = vmatpush3.msra.mxu1 %v202_v17 }
  0x47   :  { %185 = vmatprep.subr.mxu0 %v95_v1  ;;  %485 = vmatprep.subr.mxu1 %v624_v18 }
  0x48   :  { %186 = vmatpush2.msra.mxu0 %v94_v3 }
  0x49   :  { %187 = vmatprep.subr.mxu0 %v93_v4 }
  0x4a   :  { %188 = vmatpush2.msra.mxu0 %v92_v5 }
  0x4b   :  { %189 = vmatprep.subr.mxu0 %v91_v6 }
  0x4c   :  { %190 = vmatpush2.msra.mxu0 %v90_v7 }
  0x4d   :  { %191 = vmatprep.subr.mxu0 %v89_v8 }
  0x4e   :  { %192 = vmatpush2.msra.mxu0 %v88_v9 }
  0x4f   :  { %194 = vmatmul.mubr.f32.vlgmr.msra.gmra.mxu0 %v677_v19  ;;  %v106_v19 = vlaneseq }
  0x51   :  { %v107_v20 = vshrl.u32 %v106_v19, 7 }
  0x53   :  { %v108_v21 = vsub.s32 0, %v107_v20  ;;  %v112_v23 = vsub.s32 1, %v107_v20 }
  0x55   :  { %v109_v24 = vrot.slane %v104_v22, %v108_v21  ;;  %v113_v25 = vrot.slane %v104_v22, %v112_v23 }
 0x10f   :  { %v195_v26 = vpop.f32.mrf.mxu0 }
 0x110   :  { %v196_v27 = vadd.f32 %v195_v26, %v109_v24 }
 0x111   :  { %v197_v28 = vpop.f32.mrf.mxu0 }
 0x112   :  { %v198_v29 = vadd.f32 %v197_v28, %v113_v25  ;;  %v200_v31 = vmax.f32 %v196_v27, 0.0 }
 0x114   :  { %v201_v30 = vmax.f32 %v198_v29, 0.0 }
 0x116   :  { %305 = vmatprep.mubr.f32.mxu1 %v201_v30 }
 0x117   :  { %306 = vmatmul.mubr.f32.vlgmr.msra.gmra.mxu1 %v200_v31 }
 0x118   :  { %486 = vmatpush3.msra.mxu1 %v327_v32  ;;  %517 = vmatprep.mubr.msk.f32.mxu1 %vm625_vm1, %v624_v18 }
 0x119   :  { %487 = vmatprep.subr.mxu1 %v624_v18 }
 0x11a   :  { %488 = vmatpush3.msra.mxu1 %v326_v33 }
 0x11b   :  { %489 = vmatprep.subr.mxu1 %v624_v18 }
 0x11c   :  { %490 = vmatpush3.msra.mxu1 %v325_v34 }
 0x11d   :  { %491 = vmatprep.subr.mxu1 %v624_v18 }
 0x11e   :  { %492 = vmatpush3.msra.mxu1 %v324_v35 }
 0x11f   :  { %493 = vmatprep.subr.mxu1 %v624_v18 }
 0x120   :  { %494 = vmatpush3.msra.mxu1 %v323_v36 }
 0x121   :  { %495 = vmatprep.subr.mxu1 %v624_v18 }
 0x122   :  { %496 = vmatpush3.msra.mxu1 %v322_v37 }
 0x123   :  { %497 = vmatprep.subr.mxu1 %v624_v18 }
 0x124   :  { %498 = vmatpush3.msra.mxu1 %v321_v38 }
 0x125   :  { %499 = vmatprep.subr.mxu1 %v624_v18 }
 0x126   :  { %500 = vmatpush3.msra.mxu1 %v320_v39 }
 0x127   :  { %501 = vmatprep.subr.mxu1 %v624_v18 }
 0x128   :  { %502 = vmatpush3.msra.mxu1 %v319_v40 }
 0x129   :  { %503 = vmatprep.subr.mxu1 %v624_v18 }
 0x12a   :  { %504 = vmatpush3.msra.mxu1 %v318_v41 }
 0x12b   :  { %505 = vmatprep.subr.mxu1 %v624_v18 }
 0x12c   :  { %506 = vmatpush3.msra.mxu1 %v317_v42 }
 0x12d   :  { %507 = vmatprep.subr.mxu1 %v624_v18 }
 0x12e   :  { %508 = vmatpush3.msra.mxu1 %v316_v43 }
 0x12f   :  { %509 = vmatprep.subr.mxu1 %v624_v18 }
 0x130   :  { %510 = vmatpush3.msra.mxu1 %v315_v44 }
 0x131   :  { %511 = vmatprep.subr.mxu1 %v624_v18 }
 0x132   :  { %512 = vmatpush3.msra.mxu1 %v314_v45 }
 0x133   :  { %513 = vmatprep.subr.mxu1 %v624_v18 }
 0x134   :  { %514 = vmatpush3.msra.mxu1 %v313_v46 }
 0x135   :  { %515 = vmatprep.subr.mxu1 %v624_v18 }
 0x136   :  { %516 = vmatpush3.msra.mxu1 %v312_v47 }
 0x1d7   :  { %v465_v48 = vpop.f32.mrf.mxu1 }
 0x1d9   :  { %v466_v50 = vpop.f32.mrf.mxu1 }
 0x1da   :  { %v467_v51 = vadd.f32 %v466_v50, %v465_v48 }
 0x1dc   :  { %v308_v52 = vadd.f32 %v467_v51, %v432_v49 }
 0x1de   :  { %311 = vst [vmem:[#allocation7] sm:$0x3] %v308_v52  ;;  %518 = vmatmul.mubr.f32.vlgmr.msra.gmra.mxu1 %v308_v52 }
 0x1df   :  { %581 = shalt.err (!%p578_p0)
}
 0x1e0   :  { %409 = dma.vmem_to_hbm [thread:$0]  %s407_s23, 32, %s766_s6, [#allocation4]   ;;  %vm398_vm2 = vcmask 517120  }
 0x1e1   :  { %s627_s4 = smov [#allocation8]  }
 0x1e2   :  { %s416_s26 = sshll.u32 %s627_s4, 4  ;;  %s417_s26 = int_to_ptr.vmem [resolvable:$true] %s416_s26 }
 0x1e3   :  { %s590_s27 = scalar_lea.vmem %s417_s26, 32  ;;  %p595_p2 = scmp.lt.s32.totalorder %s417_s26, %s417_s26 }
 0x1e4   :  { %p591_p1 = scmp.ne.s32.totalorder %s417_s26, %s590_s27  ;;  %p596_p3 = scmp.lt.s32.totalorder %s590_s27, %s590_s27 }
 0x1e6   :  { %p597_p4 = por %p596_p3, %p595_p2 }
 0x1e8   :  { %p598_p5 = pnand %p597_p4, %p591_p1 }
 0x29e   :  { %v394_v53 = vpop.f32.mrf.mxu1 }
 0x29f   :  { %399 = vst.msk [vmem:[#allocation8] sm:$0x3] %vm398_vm2, %v394_v53 }
 0x2a0   :  { %v519_v54 = vpop.f32.mrf.mxu1 }
 0x2a1   :  { %601 = shalt.err (!%p598_p5)
}
 0x2a2   :  { %419 = dma.vmem_to_hbm [thread:$0]  %s417_s26, 32, %s767_s7, [#allocation9]  }
 0x2a3   :  { %614 = dma.done.wait [#allocation4], 32  }
 0x2a4   :  { %615 = vsyncadd [#allocation4], 4294967264 }
 0x2a5   :  { %616 = dma.done.wait [#allocation9], 32  }
 0x2a6   :  { %617 = vsyncadd [#allocation9], 4294967264 }
 0x2a7   :  { %426 = vsyncpa [#allocation3], 1 }
 0x2a8   :  { %427 = vsyncpa [#allocation6], 1 }
 0x2a9   :  { %428 = vsyncpa [#allocation4], 1 }
 0x2aa   :  { %429 = vsyncpa [#allocation9], 1 }

// kernel: tpu_custom_call.1
= control target key start
LH: loop header
LB: loop body
LE: loop exit
PB: predicated region body
PF: predicated region fallthrough
CT: control target
= control target key end

     0   :  { %13 = vsyncpa [#allocation3], 0  ;;  %s760_s0 = inlined_call_operand.vmem [shape: f32[2,192], index: 0, kind: input, shape index: {}]   ;;  %s761_s1 = inlined_call_operand.hbm [shape: f32[192,256], index: 1, kind: input, shape index: {}]   ;;  %s762_s2 = inlined_call_operand.vmem [shape: f32[1,256], index: 2, kind: input, shape index: {}]   ;;  %s763_s3 = inlined_call_operand.hbm [shape: f32[256,128], index: 3, kind: input, shape index: {}]   ;;  %s764_s4 = inlined_call_operand.vmem [shape: f32[1,128], index: 4, kind: input, shape index: {}]   ;;  %s765_s5 = inlined_call_operand.vmem [shape: f32[128,64], index: 5, kind: input, shape index: {}]   ;;  %s766_s6 = inlined_call_operand.hbm [shape: f32[2,128], index: 6, kind: output, shape index: {0}]   ;;  %s767_s7 = inlined_call_operand.hbm [shape: f32[2,64], index: 7, kind: output, shape index: {1}]  }
   0x1   :  { %14 = vsyncpa [#allocation6], 0 }
   0x2   :  { %15 = vsyncpa [#allocation4], 0 }
   0x3   :  { %16 = vsyncpa [#allocation9], 0  ;;  %s618_s24 = smov [#allocation2]  }
   0x4   :  { %s24_s25 = sshll.u32 %s618_s24, 4  ;;  %s25_s25 = int_to_ptr.vmem [resolvable:$true] %s24_s25 }
   0x5   :  { %s538_s26 = scalar_lea.vmem %s25_s25, 6144  ;;  %p543_p1 = scmp.lt.s32.totalorder %s25_s25, %s25_s25 }
   0x6   :  { %p539_p0 = scmp.ne.s32.totalorder %s25_s25, %s538_s26  ;;  %p544_p2 = scmp.lt.s32.totalorder %s538_s26, %s538_s26 }
   0x8   :  { %p545_p3 = por %p544_p2, %p543_p1 }
   0xa   :  { %p546_p4 = pnand %p545_p3, %p539_p0 }
   0xc   :  { %549 = shalt.err (!%p546_p4)
}
   0xd   :  { %s619_s27 = smov 256   ;;  %s620_s28 = smov 16  }
   0xe   :  { %30 = dma.hbm_to_vmem [thread:$0]  %s761_s1, 6144, %s25_s25, [#allocation3], %s619_s27, %s619_s27, %s620_s28  }
   0xf   :  { %s621_s8 = smov [#allocation5]  }
  0x10   :  { %s38_s9 = sshll.u32 %s621_s8, 4  ;;  %s39_s9 = int_to_ptr.vmem [resolvable:$true] %s38_s9 }
  0x11   :  { %s558_s10 = scalar_lea.vmem %s39_s9, 4096  ;;  %p563_p6 = scmp.lt.s32.totalorder %s39_s9, %s39_s9 }
  0x12   :  { %p559_p5 = scmp.ne.s32.totalorder %s39_s9, %s558_s10  ;;  %p564_p7 = scmp.lt.s32.totalorder %s558_s10, %s558_s10 }
  0x14   :  { %p565_p8 = por %p564_p7, %p563_p6 }
  0x16   :  { %p566_p9 = pnand %p565_p8, %p559_p5 }
  0x18   :  { %569 = shalt.err (!%p566_p9)
}
  0x19   :  { %s622_s11 = smov 128   ;;  %s623_s12 = smov 8  }
  0x1a   :  { %44 = dma.hbm_to_vmem [thread:$0]  %s763_s3, 4096, %s39_s9, [#allocation6], %s622_s11, %s622_s11, %s623_s12  }
  0x1b   :  { %610 = dma.done.wait [#allocation3], 6144  }
  0x1c   :  { %611 = vsyncadd [#allocation3], 4294961152 }
  0x1d   :  { %612 = dma.done.wait [#allocation6], 4096  }
  0x1e   :  { %613 = vsyncadd [#allocation6], 4294963200  ;;  %v87_v0 = vld [vmem:[#allocation2 + $0xf8] sm:$0xff]  ;;  %v86_v1 = vld [vmem:[#allocation2 + $0xf0] sm:$0xff]  ;;  %vm126_vm0 = vcmask 523264   ;;  %vm625_vm1 = vmmov 0  }
  0x1f   :  { %v85_v2 = vld [vmem:[#allocation2 + $0xe8] sm:$0xff]  ;;  %129 = vmatprep.subr.mxu0 %v87_v0  ;;  %v84_v3 = vld [vmem:[#allocation2 + $0xe0] sm:$0xff]  ;;  %v83_v4 = vld [vmem:[#allocation2 + $0xd8] sm:$0xff]  ;;  %s626_s22 = smov [#allocation7]  }
  0x20   :  { %130 = vmatpush1.msra.mxu0 %v86_v1  ;;  %v82_v5 = vld [vmem:[#allocation2 + $0xd0] sm:$0xff]  ;;  %v81_v6 = vld [vmem:[#allocation2 + $0xc8] sm:$0xff]  ;;  %v80_v7 = vld [vmem:[#allocation2 + $0xc0] sm:$0xff]  ;;  %s406_s23 = sshll.u32 %s626_s22, 4  ;;  %s407_s23 = int_to_ptr.vmem [resolvable:$true] %s406_s23 }
  0x21   :  { %131 = vmatprep.subr.mxu0 %v85_v2  ;;  %v79_v8 = vld [vmem:[#allocation2 + $0xb8] sm:$0xff]  ;;  %v78_v9 = vld [vmem:[#allocation2 + $0xb0] sm:$0xff]  ;;  %v77_v10 = vld [vmem:[#allocation2 + $0xa8] sm:$0xff]  ;;  %s570_s24 = scalar_lea.vmem %s407_s23, 32  ;;  %p575_p11 = scmp.lt.s32.totalorder %s407_s23, %s407_s23 }
  0x22   :  { %132 = vmatpush1.msra.mxu0 %v84_v3  ;;  %v76_v11 = vld [vmem:[#allocation2 + $0xa0] sm:$0xff]  ;;  %v75_v12 = vld [vmem:[#allocation2 + $0x98] sm:$0xff]  ;;  %v74_v13 = vld [vmem:[#allocation2 + $0x90] sm:$0xff]  ;;  %p571_p10 = scmp.ne.s32.totalorder %s407_s23, %s570_s24  ;;  %p576_p12 = scmp.lt.s32.totalorder %s570_s24, %s570_s24 }
  0x23   :  { %133 = vmatprep.subr.mxu0 %v83_v4  ;;  %v73_v14 = vld [vmem:[#allocation2 + $0x88] sm:$0xff]  ;;  %v72_v15 = vld [vmem:[#allocation2 + $0x80] sm:$0xff]  ;;  %v71_v16 = vld [vmem:[#allocation2 + $0x78] sm:$0xff] }
  0x24   :  { %134 = vmatpush1.msra.mxu0 %v82_v5  ;;  %v70_v17 = vld [vmem:[#allocation2 + $0x70] sm:$0xff]  ;;  %v69_v18 = vld [vmem:[#allocation2 + $0x68] sm:$0xff]  ;;  %v677_v19 = vld.sshfl [vmem:[%s760_s0] sm:$0x33 pattern:$0x76325410]  ;;  %p577_p13 = por %p576_p12, %p575_p11 }
  0x25   :  { %135 = vmatprep.subr.mxu0 %v81_v6  ;;  %v233_v20 = vld [vmem:[#allocation5 + $0xf8] sm:$0xff]  ;;  %v68_v22 = vld [vmem:[#allocation2 + $0x60] sm:$0xff]  ;;  %v124_v23 = vcombine.high %v677_v19, %v677_v19  ;;  %v232_v24 = vld [vmem:[#allocation5 + $0xf0] sm:$0xff] }
  0x26   :  { %136 = vmatpush1.msra.mxu0 %v80_v7  ;;  %v217_v21 = vld [vmem:[#allocation5 + $0x78] sm:$0xff]  ;;  %433 = vmatprep.subr.mxu1 %v233_v20  ;;  %v216_v26 = vld [vmem:[#allocation5 + $0x70] sm:$0xff]  ;;  %v231_v28 = vld [vmem:[#allocation5 + $0xe8] sm:$0xff]  ;;  %p578_p0 = pnand %p577_p13, %p571_p10 }
  0x27   :  { %137 = vmatprep.subr.mxu0 %v79_v8  ;;  %v67_v25 = vld [vmem:[#allocation2 + $0x58] sm:$0xff]  ;;  %434 = vmatpush3.msra.mxu1 %v217_v21  ;;  %v66_v27 = vld [vmem:[#allocation2 + $0x50] sm:$0xff]  ;;  %v65_v29 = vld [vmem:[#allocation2 + $0x48] sm:$0xff] }
  0x28   :  { %138 = vmatpush1.msra.mxu0 %v78_v9  ;;  %431 = vmatprep.mubr.msk.f32.mxu0 %vm126_vm0, %v124_v23  ;;  %v215_v30 = vld [vmem:[#allocation5 + $0x68] sm:$0xff]  ;;  %v64_v31 = vld [vmem:[#allocation2 + $0x40] sm:$0xff]  ;;  %v63_v33 = vld [vmem:[#allocation2 + $0x38] sm:$0xff] }
  0x29   :  { %139 = vmatprep.subr.mxu0 %v77_v10  ;;  %435 = vmatprep.subr.mxu1 %v232_v24  ;;  %v230_v32 = vld [vmem:[#allocation5 + $0xe0] sm:$0xff]  ;;  %v62_v35 = vld [vmem:[#allocation2 + $0x30] sm:$0xff]  ;;  %v229_v36 = vld [vmem:[#allocation5 + $0xd8] sm:$0xff] }
  0x2a   :  { %140 = vmatpush1.msra.mxu0 %v76_v11  ;;  %436 = vmatpush3.msra.mxu1 %v216_v26  ;;  %v214_v34 = vld [vmem:[#allocation5 + $0x60] sm:$0xff]  ;;  %v61_v37 = vld [vmem:[#allocation2 + $0x28] sm:$0xff]  ;;  %v213_v38 = vld [vmem:[#allocation5 + $0x58] sm:$0xff] }
  0x2b   :  { %141 = vmatprep.subr.mxu0 %v75_v12  ;;  %437 = vmatprep.subr.mxu1 %v231_v28  ;;  %v60_v39 = vld [vmem:[#allocation2 + $0x20] sm:$0xff]  ;;  %v228_v40 = vld [vmem:[#allocation5 + $0xd0] sm:$0xff]  ;;  %v59_v41 = vld [vmem:[#allocation2 + $0x18] sm:$0xff] }
  0x2c   :  { %142 = vmatpush1.msra.mxu0 %v74_v13  ;;  %438 = vmatpush3.msra.mxu1 %v215_v30  ;;  %v212_v42 = vld [vmem:[#allocation5 + $0x50] sm:$0xff]  ;;  %v227_v44 = vld [vmem:[#allocation5 + $0xc8] sm:$0xff]  ;;  %v56_v47 = vld [vmem:[#allocation2] sm:$0xff] }
  0x2d   :  { %143 = vmatprep.subr.mxu0 %v73_v14  ;;  %439 = vmatprep.subr.mxu1 %v230_v32  ;;  %v58_v43 = vld [vmem:[#allocation2 + $0x10] sm:$0xff]  ;;  %v57_v45 = vld [vmem:[#allocation2 + $0x8] sm:$0xff]  ;;  %v226_v48 = vld [vmem:[#allocation5 + $0xc0] sm:$0xff] }
  0x2e   :  { %144 = vmatpush1.msra.mxu0 %v72_v15  ;;  %440 = vmatpush3.msra.mxu1 %v214_v34  ;;  %v211_v46 = vld [vmem:[#allocation5 + $0x48] sm:$0xff]  ;;  %v103_v49 = vld [vmem:[#allocation2 + $0x178] sm:$0xff]  ;;  %v210_v50 = vld [vmem:[#allocation5 + $0x40] sm:$0xff] }
  0x2f   :  { %145 = vmatprep.subr.mxu0 %v71_v16  ;;  %441 = vmatprep.subr.mxu1 %v229_v36  ;;  %v102_v51 = vld [vmem:[#allocation2 + $0x170] sm:$0xff]  ;;  %v225_v52 = vld [vmem:[#allocation5 + $0xb8] sm:$0xff]  ;;  %v101_v53 = vld [vmem:[#allocation2 + $0x168] sm:$0xff] }
  0x30   :  { %146 = vmatpush1.msra.mxu0 %v70_v17  ;;  %442 = vmatpush3.msra.mxu1 %v213_v38  ;;  %v209_v54 = vld [vmem:[#allocation5 + $0x38] sm:$0xff]  ;;  %v100_v55 = vld [vmem:[#allocation2 + $0x160] sm:$0xff]  ;;  %v224_v56 = vld [vmem:[#allocation5 + $0xb0] sm:$0xff] }
  0x31   :  { %147 = vmatprep.subr.mxu0 %v69_v18  ;;  %443 = vmatprep.subr.mxu1 %v228_v40  ;;  %v99_v57 = vld [vmem:[#allocation2 + $0x158] sm:$0xff]  ;;  %v208_v58 = vld [vmem:[#allocation5 + $0x30] sm:$0xff]  ;;  %v223_v60 = vld [vmem:[#allocation5 + $0xa8] sm:$0xff]  ;;  %v624_v18 = vmov 0.0  }
  0x32   :  { %148 = vmatpush1.msra.mxu0 %v68_v22  ;;  %444 = vmatpush3.msra.mxu1 %v212_v42  ;;  %v98_v59 = vld [vmem:[#allocation2 + $0x150] sm:$0xff]  ;;  %v97_v61 = vld [vmem:[#allocation2 + $0x148] sm:$0xff]  ;;  %v96_v63 = vld [vmem:[#allocation2 + $0x140] sm:$0xff] }
  0x33   :  { %149 = vmatprep.subr.mxu0 %v67_v25  ;;  %445 = vmatprep.subr.mxu1 %v227_v44  ;;  %v207_v62 = vld [vmem:[#allocation5 + $0x28] sm:$0xff]  ;;  %v222_v0 = vld [vmem:[#allocation5 + $0xa0] sm:$0xff]  ;;  %v95_v1 = vld [vmem:[#allocation2 + $0x138] sm:$0xff] }
  0x34   :  { %150 = vmatpush1.msra.mxu0 %v66_v27  ;;  %446 = vmatpush3.msra.mxu1 %v211_v46  ;;  %v206_v2 = vld [vmem:[#allocation5 + $0x20] sm:$0xff]  ;;  %v94_v3 = vld [vmem:[#allocation2 + $0x130] sm:$0xff]  ;;  %v93_v4 = vld [vmem:[#allocation2 + $0x128] sm:$0xff] }
  0x35   :  { %151 = vmatprep.subr.mxu0 %v65_v29  ;;  %447 = vmatprep.subr.mxu1 %v226_v48  ;;  %v92_v5 = vld [vmem:[#allocation2 + $0x120] sm:$0xff]  ;;  %v91_v6 = vld [vmem:[#allocation2 + $0x118] sm:$0xff]  ;;  %v90_v7 = vld [vmem:[#allocation2 + $0x110] sm:$0xff] }
  0x36   :  { %152 = vmatpush1.msra.mxu0 %v64_v31  ;;  %448 = vmatpush3.msra.mxu1 %v210_v50  ;;  %v89_v8 = vld [vmem:[#allocation2 + $0x108] sm:$0xff]  ;;  %v88_v9 = vld [vmem:[#allocation2 + $0x100] sm:$0xff]  ;;  %v221_v10 = vld [vmem:[#allocation5 + $0x98] sm:$0xff] }
  0x37   :  { %153 = vmatprep.subr.mxu0 %v63_v33  ;;  %449 = vmatprep.subr.mxu1 %v225_v52  ;;  %v205_v11 = vld [vmem:[#allocation5 + $0x18] sm:$0xff]  ;;  %v220_v12 = vld [vmem:[#allocation5 + $0x90] sm:$0xff]  ;;  %v219_v14 = vld [vmem:[#allocation5 + $0x88] sm:$0xff] }
  0x38   :  { %154 = vmatpush1.msra.mxu0 %v62_v35  ;;  %450 = vmatpush3.msra.mxu1 %v209_v54  ;;  %v204_v13 = vld [vmem:[#allocation5 + $0x10] sm:$0xff]  ;;  %v203_v15 = vld [vmem:[#allocation5 + $0x8] sm:$0xff]  ;;  %v218_v16 = vld [vmem:[#allocation5 + $0x80] sm:$0xff] }
  0x39   :  { %155 = vmatprep.subr.mxu0 %v61_v37  ;;  %451 = vmatprep.subr.mxu1 %v224_v56  ;;  %v202_v17 = vld [vmem:[#allocation5] sm:$0xff]  ;;  %v327_v32 = vld [vmem:[%s765_s5 + $0x78] sm:$0xff]  ;;  %v326_v33 = vld [vmem:[%s765_s5 + $0x70] sm:$0xff] }
  0x3a   :  { %156 = vmatpush1.msra.mxu0 %v60_v39  ;;  %452 = vmatpush3.msra.mxu1 %v208_v58  ;;  %v104_v22 = vld [vmem:[%s762_s2] sm:$0x3]  ;;  %v325_v34 = vld [vmem:[%s765_s5 + $0x68] sm:$0xff]  ;;  %v323_v36 = vld [vmem:[%s765_s5 + $0x58] sm:$0xff] }
  0x3b   :  { %157 = vmatprep.subr.mxu0 %v59_v41  ;;  %453 = vmatprep.subr.mxu1 %v223_v60  ;;  %v324_v35 = vld [vmem:[%s765_s5 + $0x60] sm:$0xff]  ;;  %v322_v37 = vld [vmem:[%s765_s5 + $0x50] sm:$0xff]  ;;  %v321_v38 = vld [vmem:[%s765_s5 + $0x48] sm:$0xff] }
  0x3c   :  { %158 = vmatpush1.msra.mxu0 %v58_v43  ;;  %454 = vmatpush3.msra.mxu1 %v207_v62  ;;  %v320_v39 = vld [vmem:[%s765_s5 + $0x40] sm:$0xff]  ;;  %v319_v40 = vld [vmem:[%s765_s5 + $0x38] sm:$0xff]  ;;  %v318_v41 = vld [vmem:[%s765_s5 + $0x30] sm:$0xff] }
  0x3d   :  { %159 = vmatprep.subr.mxu0 %v57_v45  ;;  %455 = vmatprep.subr.mxu1 %v222_v0  ;;  %v317_v42 = vld [vmem:[%s765_s5 + $0x28] sm:$0xff]  ;;  %v316_v43 = vld [vmem:[%s765_s5 + $0x20] sm:$0xff]  ;;  %v315_v44 = vld [vmem:[%s765_s5 + $0x18] sm:$0xff] }
  0x3e   :  { %160 = vmatpush1.msra.mxu0 %v56_v47  ;;  %456 = vmatpush3.msra.mxu1 %v206_v2  ;;  %v314_v45 = vld [vmem:[%s765_s5 + $0x10] sm:$0xff]  ;;  %v313_v46 = vld [vmem:[%s765_s5 + $0x8] sm:$0xff]  ;;  %v312_v47 = vld [vmem:[%s765_s5] sm:$0xff] }
  0x3f   :  { %177 = vmatprep.subr.mxu0 %v103_v49  ;;  %457 = vmatprep.subr.mxu1 %v221_v10  ;;  %v432_v49 = vld [vmem:[%s764_s4] ss:$0 sm:$0xff] }
  0x40   :  { %178 = vmatpush2.msra.mxu0 %v102_v51  ;;  %458 = vmatpush3.msra.mxu1 %v205_v11 }
  0x41   :  { %179 = vmatprep.subr.mxu0 %v101_v53  ;;  %459 = vmatprep.subr.mxu1 %v220_v12 }
  0x42   :  { %180 = vmatpush2.msra.mxu0 %v100_v55  ;;  %460 = vmatpush3.msra.mxu1 %v204_v13 }
  0x43   :  { %181 = vmatprep.subr.mxu0 %v99_v57  ;;  %461 = vmatprep.subr.mxu1 %v219_v14 }
  0x44   :  { %182 = vmatpush2.msra.mxu0 %v98_v59  ;;  %462 = vmatpush3.msra.mxu1 %v203_v15 }
  0x45   :  { %183 = vmatprep.subr.mxu0 %v97_v61  ;;  %463 = vmatprep.subr.mxu1 %v218_v16 }
  0x46   :  { %184 = vmatpush2.msra.mxu0 %v96_v63  ;;  %464 = vmatpush3.msra.mxu1 %v202_v17 }
  0x47   :  { %185 = vmatprep.subr.mxu0 %v95_v1  ;;  %485 = vmatprep.subr.mxu1 %v624_v18 }
  0x48   :  { %186 = vmatpush2.msra.mxu0 %v94_v3 }
  0x49   :  { %187 = vmatprep.subr.mxu0 %v93_v4 }
  0x4a   :  { %188 = vmatpush2.msra.mxu0 %v92_v5 }
  0x4b   :  { %189 = vmatprep.subr.mxu0 %v91_v6 }
  0x4c   :  { %190 = vmatpush2.msra.mxu0 %v90_v7 }
  0x4d   :  { %191 = vmatprep.subr.mxu0 %v89_v8 }
  0x4e   :  { %192 = vmatpush2.msra.mxu0 %v88_v9 }
  0x4f   :  { %194 = vmatmul.mubr.f32.vlgmr.msra.gmra.mxu0 %v677_v19  ;;  %v106_v19 = vlaneseq }
  0x51   :  { %v107_v20 = vshrl.u32 %v106_v19, 7 }
  0x53   :  { %v108_v21 = vsub.s32 0, %v107_v20  ;;  %v112_v23 = vsub.s32 1, %v107_v20 }
  0x55   :  { %v109_v24 = vrot.slane %v104_v22, %v108_v21  ;;  %v113_v25 = vrot.slane %v104_v22, %v112_v23 }
 0x10f   :  { %v195_v26 = vpop.f32.mrf.mxu0 }
 0x110   :  { %v196_v27 = vadd.f32 %v195_v26, %v109_v24 }
 0x111   :  { %v197_v28 = vpop.f32.mrf.mxu0 }
 0x112   :  { %v198_v29 = vadd.f32 %v197_v28, %v113_v25  ;;  %v200_v31 = vmax.f32 %v196_v27, 0.0 }
 0x114   :  { %v201_v30 = vmax.f32 %v198_v29, 0.0 }
 0x116   :  { %305 = vmatprep.mubr.f32.mxu1 %v201_v30 }
 0x117   :  { %306 = vmatmul.mubr.f32.vlgmr.msra.gmra.mxu1 %v200_v31 }
 0x118   :  { %486 = vmatpush3.msra.mxu1 %v327_v32  ;;  %517 = vmatprep.mubr.msk.f32.mxu1 %vm625_vm1, %v624_v18 }
 0x119   :  { %487 = vmatprep.subr.mxu1 %v624_v18 }
 0x11a   :  { %488 = vmatpush3.msra.mxu1 %v326_v33 }
 0x11b   :  { %489 = vmatprep.subr.mxu1 %v624_v18 }
 0x11c   :  { %490 = vmatpush3.msra.mxu1 %v325_v34 }
 0x11d   :  { %491 = vmatprep.subr.mxu1 %v624_v18 }
 0x11e   :  { %492 = vmatpush3.msra.mxu1 %v324_v35 }
 0x11f   :  { %493 = vmatprep.subr.mxu1 %v624_v18 }
 0x120   :  { %494 = vmatpush3.msra.mxu1 %v323_v36 }
 0x121   :  { %495 = vmatprep.subr.mxu1 %v624_v18 }
 0x122   :  { %496 = vmatpush3.msra.mxu1 %v322_v37 }
 0x123   :  { %497 = vmatprep.subr.mxu1 %v624_v18 }
 0x124   :  { %498 = vmatpush3.msra.mxu1 %v321_v38 }
 0x125   :  { %499 = vmatprep.subr.mxu1 %v624_v18 }
 0x126   :  { %500 = vmatpush3.msra.mxu1 %v320_v39 }
 0x127   :  { %501 = vmatprep.subr.mxu1 %v624_v18 }
 0x128   :  { %502 = vmatpush3.msra.mxu1 %v319_v40 }
 0x129   :  { %503 = vmatprep.subr.mxu1 %v624_v18 }
 0x12a   :  { %504 = vmatpush3.msra.mxu1 %v318_v41 }
 0x12b   :  { %505 = vmatprep.subr.mxu1 %v624_v18 }
 0x12c   :  { %506 = vmatpush3.msra.mxu1 %v317_v42 }
 0x12d   :  { %507 = vmatprep.subr.mxu1 %v624_v18 }
 0x12e   :  { %508 = vmatpush3.msra.mxu1 %v316_v43 }
 0x12f   :  { %509 = vmatprep.subr.mxu1 %v624_v18 }
 0x130   :  { %510 = vmatpush3.msra.mxu1 %v315_v44 }
 0x131   :  { %511 = vmatprep.subr.mxu1 %v624_v18 }
 0x132   :  { %512 = vmatpush3.msra.mxu1 %v314_v45 }
 0x133   :  { %513 = vmatprep.subr.mxu1 %v624_v18 }
 0x134   :  { %514 = vmatpush3.msra.mxu1 %v313_v46 }
 0x135   :  { %515 = vmatprep.subr.mxu1 %v624_v18 }
 0x136   :  { %516 = vmatpush3.msra.mxu1 %v312_v47 }
 0x1d7   :  { %v465_v48 = vpop.f32.mrf.mxu1 }
 0x1d9   :  { %v466_v50 = vpop.f32.mrf.mxu1 }
 0x1da   :  { %v467_v51 = vadd.f32 %v466_v50, %v465_v48 }
 0x1dc   :  { %v308_v52 = vadd.f32 %v467_v51, %v432_v49 }
 0x1de   :  { %311 = vst [vmem:[#allocation7] sm:$0x3] %v308_v52  ;;  %518 = vmatmul.mubr.f32.vlgmr.msra.gmra.mxu1 %v308_v52 }
 0x1df   :  { %581 = shalt.err (!%p578_p0)
}
 0x1e0   :  { %409 = dma.vmem_to_hbm [thread:$0]  %s407_s23, 32, %s766_s6, [#allocation4]   ;;  %vm398_vm2 = vcmask 517120  }
 0x1e1   :  { %s627_s4 = smov [#allocation8]  }
 0x1e2   :  { %s416_s26 = sshll.u32 %s627_s4, 4  ;;  %s417_s26 = int_to_ptr.vmem [resolvable:$true] %s416_s26 }
 0x1e3   :  { %s590_s27 = scalar_lea.vmem %s417_s26, 32  ;;  %p595_p2 = scmp.lt.s32.totalorder %s417_s26, %s417_s26 }
 0x1e4   :  { %p591_p1 = scmp.ne.s32.totalorder %s417_s26, %s590_s27  ;;  %p596_p3 = scmp.lt.s32.totalorder %s590_s27, %s590_s27 }
 0x1e6   :  { %p597_p4 = por %p596_p3, %p595_p2 }
 0x1e8   :  { %p598_p5 = pnand %p597_p4, %p591_p1 }
 0x29e   :  { %v394_v53 = vpop.f32.mrf.mxu1 }
 0x29f   :  { %399 = vst.msk [vmem:[#allocation8] sm:$0x3] %vm398_vm2, %v394_v53 }
 0x2a0   :  { %v519_v54 = vpop.f32.mrf.mxu1 }
 0x2a1   :  { %601 = shalt.err (!%p598_p5)
}
 0x2a2   :  { %419 = dma.vmem_to_hbm [thread:$0]  %s417_s26, 32, %s767_s7, [#allocation9]  }
 0x2a3   :  { %614 = dma.done.wait [#allocation4], 32  }
 0x2a4   :  { %615 = vsyncadd [#allocation4], 4294967264 }
 0x2a5   :  { %616 = dma.done.wait [#allocation9], 32  }
 0x2a6   :  { %617 = vsyncadd [#allocation9], 4294967264 }
 0x2a7   :  { %426 = vsyncpa [#allocation3], 1 }
 0x2a8   :  { %427 = vsyncpa [#allocation6], 1 }
 0x2a9   :  { %428 = vsyncpa [#allocation4], 1 }
 0x2aa   :  { %429 = vsyncpa [#allocation9], 1 }

</bundles_post_ra>
